<compile_context>
chip_gen: v6e
topology: v6e:2x2x1
jax: 0.10.0
libtpu: 0.0.40
codegen_flags: <defaults>
</compile_context>

<pallas_src>
import jax
import jax.numpy as jnp
from jax.experimental import pallas as pl
from jax.experimental.pallas import tpu as pltpu


def _identity_dma_kernel(x_hbm_ref, o_hbm_ref, sem):
    # Single whole-array HBM -> HBM DMA.  No VMEM staging, no vector work.
    cp = pltpu.make_async_copy(x_hbm_ref, o_hbm_ref, sem)
    cp.start()
    cp.wait()


def notrans_forward(input_embd: jnp.ndarray) -> jnp.ndarray:
    """Identity forward of the `notrans` module as a Pallas TPU kernel.

    input_embd: [N, H] node-embedding matrix (any dtype / shape).
    Returns an array equal to input_embd.

    NOTE: at the model level this op should simply be elided (or the output
    aliased to the input) for zero HBM traffic; the kernel below is the
    minimal-cost version when a real copy must be materialized.
    """
    return pl.pallas_call(
        _identity_dma_kernel,
        out_shape=jax.ShapeDtypeStruct(input_embd.shape, input_embd.dtype),
        # Leave both operands in HBM; the kernel issues one DMA for the full
        # array (no grid, no VMEM double-buffering, no per-step overhead).
        in_specs=[pl.BlockSpec(memory_space=pl.ANY)],
        out_specs=pl.BlockSpec(memory_space=pl.ANY),
        scratch_shapes=[pltpu.SemaphoreType.DMA(())],
    )(input_embd)


if __name__ == "__main__":
    key = jax.random.PRNGKey(0)

    # Small node-embedding-like input: 16 nodes x 32 hidden dims (f32).
    x = jax.random.normal(key, (16, 32), dtype=jnp.float32)
    y = notrans_forward(x)
    jax.block_until_ready(y)
    assert y.shape == x.shape and y.dtype == x.dtype
    assert bool(jnp.array_equal(y, x))

    # A couple of extra shapes/dtypes to show the DMA path is shape/dtype
    # agnostic (odd row counts, bf16).
    k1, k2 = jax.random.split(key)
    x2 = jax.random.normal(k1, (100, 256), dtype=jnp.float32)
    y2 = notrans_forward(x2)
    jax.block_until_ready(y2)
    assert bool(jnp.array_equal(y2, x2))

    x3 = jax.random.normal(k2, (64, 256), dtype=jnp.float32).astype(jnp.bfloat16)
    y3 = notrans_forward(x3)
    jax.block_until_ready(y3)
    assert y3.dtype == jnp.bfloat16
    assert bool(jnp.array_equal(y3, x3))

    print("KERNEL_OK")
</pallas_src>

<mosaic_0001>
module attributes {stable_mosaic.version = 11 : i64} {
  func.func @_identity_dma_kernel(%arg0: memref<16x32xf32, #tpu.memory_space<any>>, %arg1: memref<16x32xf32, #tpu.memory_space<any>>, %arg2: memref<!tpu.dma_semaphore, #tpu.memory_space<semaphore_mem>>) attributes {dimension_semantics = [], scalar_prefetch = 0 : i64, scratch_operands = 1 : i64, tpu.core_type = #tpu.core_type<tc>} {
    tpu.enqueue_dma source(%arg0 : memref<16x32xf32, #tpu.memory_space<any>>) target(%arg1 : memref<16x32xf32, #tpu.memory_space<any>>) target_semaphore(%arg2 : memref<!tpu.dma_semaphore, #tpu.memory_space<semaphore_mem>>)
    tpu.wait_dma2 semaphore(%arg2 : memref<!tpu.dma_semaphore, #tpu.memory_space<semaphore_mem>>) src(%arg0 : memref<16x32xf32, #tpu.memory_space<any>>) dst(%arg1 : memref<16x32xf32, #tpu.memory_space<any>>)
    return
  }
}

</mosaic_0001>

<bundles_post_ra>
// kernel: tpu_custom_call.1
= control target key start
LH: loop header
LB: loop body
LE: loop exit
PB: predicated region body
PF: predicated region fallthrough
CT: control target
= control target key end

     0   :  { %s28_s6 = smov [#allocation2]   ;;  %s29_s7 = smov 131072   ;;  %s47_s0 = inlined_call_operand.hbm [shape: f32[16,32], index: 0, kind: input, shape index: {}]   ;;  %s48_s1 = inlined_call_operand.hbm [shape: f32[16,32], index: 1, kind: output, shape index: {}]  }
   0x1   :  { %s30_s8 = smov 0  }
   0x2   :  { %12 = dma.general %s47_s0, 256, %s48_s1, %s28_s6, %s29_s7, [#allocation4], %s30_s8, 0  }
   0x3   :  { %26 = dma.done.wait [#allocation2], 256 }
   0x4   :  { %27 = vsyncadd [#allocation2], 4294967040 }
   0x5   :  { %16 = vsyncmov [#allocation2] }
   0x8   :  { %s17_s13 = vpop.sfrf %16 }
   0x9   :  { %p22_p0 = scmp.ne.s32.totalorder %s17_s13, 0 }
   0xb   :  { %21 = shalt.err (%p22_p0)  }

</bundles_post_ra>
